<compile_context>
chip_gen: v7x
topology: tpu7x:2x2x1
jax: 0.10.0
libtpu: 0.0.40
codegen_flags: <defaults>
</compile_context>

<pallas_src>
import functools
import math

import jax
import jax.numpy as jnp
from jax.experimental import pallas as pl
from jax.experimental.pallas import tpu as pltpu


# ----------------------------------------------------------------------------------
# In-kernel helpers
# ----------------------------------------------------------------------------------
def _silu_f32(y):
    # exp runs on the EUP; approx reciprocal also runs on the EUP (keeps the divide off the VALU).
    return y * pl.reciprocal(1.0 + jnp.exp(-y), approx=True)


# ----------------------------------------------------------------------------------
# Pallas kernels
# ----------------------------------------------------------------------------------
def _mm_kernel(x_ref, w_ref, s_ref, b_ref, o_ref, acc_ref, *, act):
    # grid = (M tiles, Cout tiles, K tiles); K is last ("arbitrary") with an f32 accumulator.
    @pl.when(pl.program_id(2) == 0)
    def _():
        acc_ref[...] = jnp.zeros_like(acc_ref)

    acc_ref[...] += jnp.dot(x_ref[...], w_ref[...], preferred_element_type=jnp.float32)

    @pl.when(pl.program_id(2) == pl.num_programs(2) - 1)
    def _():
        y = acc_ref[...] * s_ref[...] + b_ref[...]
        if act:
            y = _silu_f32(y)
        o_ref[...] = y.astype(o_ref.dtype)


def _mm_multi_kernel(*refs, n_in, act):
    # refs = (x_0..x_{n-1}, w_0..w_{n-1}, s, b, o); computes sum_i x_i @ w_i  (virtual concat).
    x_refs = refs[:n_in]
    w_refs = refs[n_in:2 * n_in]
    s_ref, b_ref, o_ref = refs[2 * n_in], refs[2 * n_in + 1], refs[2 * n_in + 2]
    acc = jnp.dot(x_refs[0][...], w_refs[0][...], preferred_element_type=jnp.float32)
    for i in range(1, n_in):
        acc = acc + jnp.dot(x_refs[i][...], w_refs[i][...], preferred_element_type=jnp.float32)
    y = acc * s_ref[...] + b_ref[...]
    if act:
        y = _silu_f32(y)
    o_ref[...] = y.astype(o_ref.dtype)


def _conv3x3_s1_kernel(x_ref, w_ref, s_ref, b_ref, o_ref, *, H, W, cin, cout, act):
    # x_ref: (1, H+2, W+2, cin) zero-padded image (bf16); w_ref: (9*cin, cout) bf16.
    # One output row per loop step: 9 shifted (W, cin) x (cin, cout) matmuls, f32 accumulate.
    w = w_ref[...]
    w_taps = [w[t * cin:(t + 1) * cin, :] for t in range(9)]
    s = s_ref[...]
    b = b_ref[...]

    @pl.loop(0, H)
    def _(h):
        acc = jnp.zeros((W, cout), jnp.float32)
        for di in range(3):
            row = x_ref[:, pl.ds(h + di, 1), :, :][0, 0]          # (W+2, cin)
            for dj in range(3):
                acc = acc + jnp.dot(row[dj:dj + W, :], w_taps[di * 3 + dj],
                                    preferred_element_type=jnp.float32)
        y = acc * s + b
        if act:
            y = _silu_f32(y)
        o_ref[:, pl.ds(h, 1), :, :] = y.reshape(1, 1, W, cout).astype(o_ref.dtype)


def _spp_pool_kernel(x_ref, *o_refs, H, W, ks, pmax):
    # x_ref: (1, H+2*pmax, W+2*pmax, C) padded with a very negative value.
    # Separable max pool (row-max then col-max) for each k; one input read, len(ks) outputs.
    x = x_ref[...]
    for o_ref, k in zip(o_refs, ks):
        p = k // 2
        xk = x[:, pmax - p:pmax + H + p, pmax - p:pmax + W + p, :]
        wmax = xk[:, :, 0:W, :]
        for dj in range(1, k):
            wmax = jnp.maximum(wmax, xk[:, :, dj:dj + W, :])
        out = wmax[:, 0:H, :, :]
        for di in range(1, k):
            out = jnp.maximum(out, wmax[:, di:di + H, :, :])
        o_ref[...] = out


# ----------------------------------------------------------------------------------
# Kernel wrappers
# ----------------------------------------------------------------------------------
def _pick_tiles(M, K, Cout):
    tm = M if M <= 512 else 512                      # big M tiles; tail blocks are masked
    if Cout <= 256 or Cout % 128 != 0:
        tn = Cout
    else:
        tn = 256 if Cout % 256 == 0 else 128
    if K <= 2048:
        tk = K
    else:
        tk = next((t for t in (2048, 1024, 512, 256) if K % t == 0), K)
    return tm, tn, tk


def matmul_bias_act(x2d, w, scale, bias, act=True, out_dtype=jnp.bfloat16):
    """y = act((x2d @ w) * scale + bias); bf16 MXU inputs, f32 accumulate + epilogue."""
    M, K = x2d.shape
    Kw, Cout = w.shape
    assert K == Kw
    tm, tn, tk = _pick_tiles(M, K, Cout)
    s2 = scale.reshape(1, Cout).astype(jnp.float32)
    b2 = bias.reshape(1, Cout).astype(jnp.float32)
    grid = (pl.cdiv(M, tm), Cout // tn, pl.cdiv(K, tk))
    cost = pl.CostEstimate(
        flops=2 * M * K * Cout,
        transcendentals=M * Cout if act else 0,
        bytes_accessed=2 * (M * K + K * Cout + M * Cout) + 8 * Cout)
    return pl.pallas_call(
        functools.partial(_mm_kernel, act=act),
        out_shape=jax.ShapeDtypeStruct((M, Cout), out_dtype),
        grid=grid,
        in_specs=[
            pl.BlockSpec((tm, tk), lambda i, j, k: (i, k)),
            pl.BlockSpec((tk, tn), lambda i, j, k: (k, j)),
            pl.BlockSpec((1, tn), lambda i, j, k: (0, j)),
            pl.BlockSpec((1, tn), lambda i, j, k: (0, j)),
        ],
        out_specs=pl.BlockSpec((tm, tn), lambda i, j, k: (i, j)),
        scratch_shapes=[pltpu.VMEM((tm, tn), jnp.float32)],
        compiler_params=pltpu.CompilerParams(
            dimension_semantics=("parallel", "parallel", "arbitrary")),
        cost_estimate=cost,
    )(x2d.astype(jnp.bfloat16), w.astype(jnp.bfloat16), s2, b2)


def concat_matmul_bias_act(xs2d, ws, scale, bias, act=True, out_dtype=jnp.bfloat16):
    """y = act((concat(xs, -1) @ stack_rows(ws)) * scale + bias) WITHOUT materializing the concat."""
    n_in = len(xs2d)
    M = xs2d[0].shape[0]
    Cout = ws[0].shape[1]
    Ks = [int(x.shape[1]) for x in xs2d]
    tm = M if M <= 512 else 512
    if Cout <= 256 or Cout % 128 != 0:
        tn = Cout
    else:
        tn = 256 if Cout % 256 == 0 else 128
    grid = (pl.cdiv(M, tm), Cout // tn)
    in_specs = ([pl.BlockSpec((tm, ki), lambda i, j: (i, 0)) for ki in Ks]
                + [pl.BlockSpec((ki, tn), lambda i, j: (0, j)) for ki in Ks]
                + [pl.BlockSpec((1, tn), lambda i, j: (0, j)),
                   pl.BlockSpec((1, tn), lambda i, j: (0, j))])
    Ksum = sum(Ks)
    cost = pl.CostEstimate(
        flops=2 * M * Ksum * Cout,
        transcendentals=M * Cout if act else 0,
        bytes_accessed=2 * (M * Ksum + Ksum * Cout + M * Cout) + 8 * Cout)
    s2 = scale.reshape(1, Cout).astype(jnp.float32)
    b2 = bias.reshape(1, Cout).astype(jnp.float32)
    args = ([x.astype(jnp.bfloat16) for x in xs2d]
            + [w.astype(jnp.bfloat16) for w in ws] + [s2, b2])
    return pl.pallas_call(
        functools.partial(_mm_multi_kernel, n_in=n_in, act=act),
        out_shape=jax.ShapeDtypeStruct((M, Cout), out_dtype),
        grid=grid,
        in_specs=in_specs,
        out_specs=pl.BlockSpec((tm, tn), lambda i, j: (i, j)),
        compiler_params=pltpu.CompilerParams(dimension_semantics=("parallel", "parallel")),
        cost_estimate=cost,
    )(*args)


def conv1x1_multi(xs, w, scale, bias, act=True):
    """1x1 conv applied to a *virtual* channel-concat of xs (list of NHWC tensors)."""
    N, H, W, _ = xs[0].shape
    Cout = w.shape[1]
    cs = [int(t.shape[-1]) for t in xs]
    if len(xs) == 1:
        y = matmul_bias_act(xs[0].reshape(N * H * W, cs[0]), w, scale, bias, act=act)
        return y.reshape(N, H, W, Cout)
    x2ds = [t.reshape(N * H * W, c) for t, c in zip(xs, cs)]
    offs = [0]
    for c in cs:
        offs.append(offs[-1] + c)
    ws = [w[offs[i]:offs[i + 1], :] for i in range(len(xs))]
    y = concat_matmul_bias_act(x2ds, ws, scale, bias, act=act)
    return y.reshape(N, H, W, Cout)


def conv3x3_s1(x, p, act=True):
    """3x3 stride-1 conv + folded-BN + SiLU without HBM im2col (9 shifted in-kernel matmuls)."""
    N, H, W, Cin = x.shape
    Cout = p["cout"]
    # Per-image VMEM footprint guard; very large feature maps fall back to im2col + matmul.
    footprint = (H + 2) * (W + 2) * Cin * 2 + H * W * Cout * 2 + 9 * Cin * Cout * 2
    if footprint > 8 * 1024 * 1024:
        # TODO(synk): halo-tiled row blocking instead of im2col for very large feature maps.
        patches = extract_patches(x, 3, 1, 1)
        y = matmul_bias_act(patches.reshape(N * H * W, 9 * Cin),
                            p["w"], p["scale"], p["bias"], act=act)
        return y.reshape(N, H, W, Cout)
    xp = jnp.pad(x, ((0, 0), (1, 1), (1, 1), (0, 0)))
    s2 = p["scale"].reshape(1, Cout).astype(jnp.float32)
    b2 = p["bias"].reshape(1, Cout).astype(jnp.float32)
    cost = pl.CostEstimate(
        flops=2 * N * H * W * 9 * Cin * Cout,
        transcendentals=N * H * W * Cout if act else 0,
        bytes_accessed=2 * (N * (H + 2) * (W + 2) * Cin + 9 * Cin * Cout + N * H * W * Cout))
    return pl.pallas_call(
        functools.partial(_conv3x3_s1_kernel, H=H, W=W, cin=Cin, cout=Cout, act=act),
        out_shape=jax.ShapeDtypeStruct((N, H, W, Cout), jnp.bfloat16),
        grid=(N,),
        in_specs=[
            pl.BlockSpec((1, H + 2, W + 2, Cin), lambda n: (n, 0, 0, 0)),
            pl.BlockSpec((9 * Cin, Cout), lambda n: (0, 0)),
            pl.BlockSpec((1, Cout), lambda n: (0, 0)),
            pl.BlockSpec((1, Cout), lambda n: (0, 0)),
        ],
        out_specs=pl.BlockSpec((1, H, W, Cout), lambda n: (n, 0, 0, 0)),
        compiler_params=pltpu.CompilerParams(dimension_semantics=("parallel",)),
        cost_estimate=cost,
    )(xp.astype(jnp.bfloat16), p["w"].astype(jnp.bfloat16), s2, b2)


def spp_pools(x, ks=(5, 9, 13)):
    """Fused, separable stride-1 'same' max pools; returns [pool_k(x) for k in ks]."""
    N, H, W, C = x.shape
    pmax = max(ks) // 2
    pad_val = float(jnp.finfo(x.dtype).min)
    xp = jnp.pad(x, ((0, 0), (pmax, pmax), (pmax, pmax), (0, 0)), constant_values=pad_val)
    outs = pl.pallas_call(
        functools.partial(_spp_pool_kernel, H=H, W=W, ks=tuple(ks), pmax=pmax),
        out_shape=tuple(jax.ShapeDtypeStruct((N, H, W, C), x.dtype) for _ in ks),
        grid=(N,),
        in_specs=[pl.BlockSpec((1, H + 2 * pmax, W + 2 * pmax, C), lambda n: (n, 0, 0, 0))],
        out_specs=tuple(pl.BlockSpec((1, H, W, C), lambda n: (n, 0, 0, 0)) for _ in ks),
        compiler_params=pltpu.CompilerParams(dimension_semantics=("parallel",)),
    )(xp)
    return list(outs)


# ----------------------------------------------------------------------------------
# Plain-JAX glue (data movement only)
# ----------------------------------------------------------------------------------
def extract_patches(x, k, s, p):
    """im2col for NHWC.  Returns [N, Ho, Wo, k*k*C] with (kh, kw, C) flattening order."""
    N, H, W, C = x.shape
    xp = jnp.pad(x, ((0, 0), (p, p), (p, p), (0, 0)))
    Ho = (H + 2 * p - k) // s + 1
    Wo = (W + 2 * p - k) // s + 1
    cols = []
    for di in range(k):
        for dj in range(k):
            cols.append(xp[:, di:di + Ho * s:s, dj:dj + Wo * s:s, :])
    return jnp.concatenate(cols, axis=-1)


def upsample2_nearest(x):  # NHWC, scale_factor=2, nearest
    return jnp.repeat(jnp.repeat(x, 2, axis=1), 2, axis=2)


# ----------------------------------------------------------------------------------
# Parameter init (deterministic, synthetic; BN folded into per-channel scale/bias)
# ----------------------------------------------------------------------------------
def init_conv(key, cin, cout, k):
    kw, ks_, kb = jax.random.split(key, 3)
    fan_in = k * k * cin
    w = jax.random.normal(kw, (k, k, cin, cout), jnp.float32) * (1.0 / math.sqrt(fan_in))
    scale = 1.0 + 0.1 * jax.random.normal(ks_, (cout,), jnp.float32)
    bias = 0.1 * jax.random.normal(kb, (cout,), jnp.float32)
    # NOTE: flattening order is (kh, kw, cin) matching extract_patches / the 3x3 kernel tap order.
    # Real PyTorch Conv2d weights (cout, cin, kh, kw) would need permute(2, 3, 1, 0) first.
    return {"w": w.reshape(k * k * cin, cout).astype(jnp.bfloat16),
            "scale": scale, "bias": bias, "k": k, "cin": cin, "cout": cout}


def base_conv(x, p, stride, act=True):
    """BaseConv = Conv2d(k, stride, pad=(k-1)//2, bias=False) + BN(folded) + SiLU."""
    k = p["k"]
    if k == 1:
        N, H, W, C = x.shape
        y = matmul_bias_act(x.reshape(N * H * W, C), p["w"], p["scale"], p["bias"], act=act)
        return y.reshape(N, H, W, p["cout"])
    if stride == 1:
        return conv3x3_s1(x, p, act=act)
    patches = extract_patches(x, k, stride, (k - 1) // 2)
    N, Ho, Wo, K = patches.shape
    y = matmul_bias_act(patches.reshape(N * Ho * Wo, K), p["w"], p["scale"], p["bias"], act=act)
    return y.reshape(N, Ho, Wo, p["cout"])


def init_bottleneck(key, cin, cout, shortcut, expansion=1.0):
    hidden = int(cout * expansion)
    k1, k2 = jax.random.split(key)
    return {"conv1": init_conv(k1, cin, hidden, 1),
            "conv2": init_conv(k2, hidden, cout, 3),
            "use_add": bool(shortcut and cin == cout)}


def bottleneck(x, p):
    y = base_conv(x, p["conv1"], 1)
    y = base_conv(y, p["conv2"], 1)
    if p["use_add"]:
        y = y + x
    return y


def init_csp(key, cin, cout, n, shortcut=True, expansion=0.5):
    hidden = int(cout * expansion)
    keys = jax.random.split(key, 3 + n)
    c1 = init_conv(keys[0], cin, hidden, 1)
    c2 = init_conv(keys[1], cin, hidden, 1)
    # conv1 & conv2 share the same input: fuse them into one matmul (concat along Cout).
    return {"hidden": hidden,
            "w12": jnp.concatenate([c1["w"], c2["w"]], axis=1),
            "s12": jnp.concatenate([c1["scale"], c2["scale"]]),
            "b12": jnp.concatenate([c1["bias"], c2["bias"]]),
            "conv3": init_conv(keys[2], 2 * hidden, cout, 1),
            "m": [init_bottleneck(keys[3 + i], hidden, hidden, shortcut, 1.0)
                  for i in range(n)]}


def csp_layer(x, p):
    # `x` may be a single NHWC tensor or a list of tensors (virtual channel-concat).
    xs = list(x) if isinstance(x, (list, tuple)) else [x]
    h = p["hidden"]
    y = conv1x1_multi(xs, p["w12"], p["s12"], p["b12"], act=True)   # fused conv1 || conv2
    x1, x2 = y[..., :h], y[..., h:]
    for bp in p["m"]:
        x1 = bottleneck(x1, bp)
    c3 = p["conv3"]
    # conv3 over concat([x1, x2]) fused (no materialized concat).
    return conv1x1_multi([x1, x2], c3["w"], c3["scale"], c3["bias"], act=True)


def init_focus(key, cin, cout, k):
    return {"conv": init_conv(key, cin * 4, cout, k)}


def focus(x, p):
    tl = x[:, ::2, ::2, :]
    bl = x[:, 1::2, ::2, :]
    tr = x[:, ::2, 1::2, :]
    br = x[:, 1::2, 1::2, :]
    x = jnp.concatenate([tl, bl, tr, br], axis=-1)
    return base_conv(x, p["conv"], 1)


def init_spp(key, cin, cout, ks=(5, 9, 13)):
    hidden = cin // 2
    k1, k2 = jax.random.split(key)
    return {"conv1": init_conv(k1, cin, hidden, 1),
            "conv2": init_conv(k2, hidden * (len(ks) + 1), cout, 1),
            "ks": tuple(ks)}


def spp_bottleneck(x, p):
    x = base_conv(x, p["conv1"], 1)
    pools = spp_pools(x, p["ks"])                       # fused 5/9/13 separable max pools
    c2 = p["conv2"]
    # conv2 over concat([x, p5, p9, p13]) fused (no materialized concat).
    return conv1x1_multi([x] + pools, c2["w"], c2["scale"], c2["bias"], act=True)


def init_darknet(key, dep_mul, wid_mul):
    base_ch = int(wid_mul * 64)
    base_d = max(round(dep_mul * 3), 1)
    keys = jax.random.split(key, 10)
    return {
        "stem": init_focus(keys[0], 3, base_ch, 3),
        "dark2_conv": init_conv(keys[1], base_ch, base_ch * 2, 3),
        "dark2_csp": init_csp(keys[2], base_ch * 2, base_ch * 2, base_d),
        "dark3_conv": init_conv(keys[3], base_ch * 2, base_ch * 4, 3),
        "dark3_csp": init_csp(keys[4], base_ch * 4, base_ch * 4, base_d * 3),
        "dark4_conv": init_conv(keys[5], base_ch * 4, base_ch * 8, 3),
        "dark4_csp": init_csp(keys[6], base_ch * 8, base_ch * 8, base_d * 3),
        "dark5_conv": init_conv(keys[7], base_ch * 8, base_ch * 16, 3),
        "dark5_spp": init_spp(keys[8], base_ch * 16, base_ch * 16),
        "dark5_csp": init_csp(keys[9], base_ch * 16, base_ch * 16, base_d, shortcut=False),
    }


def darknet_forward(x, p):
    x = focus(x, p["stem"])
    x = base_conv(x, p["dark2_conv"], 2)
    x = csp_layer(x, p["dark2_csp"]); d2 = x
    x = base_conv(x, p["dark3_conv"], 2)
    x = csp_layer(x, p["dark3_csp"]); d3 = x
    x = base_conv(x, p["dark4_conv"], 2)
    x = csp_layer(x, p["dark4_csp"]); d4 = x
    x = base_conv(x, p["dark5_conv"], 2)
    x = spp_bottleneck(x, p["dark5_spp"])
    x = csp_layer(x, p["dark5_csp"]); d5 = x
    return {"dark2": d2, "dark3": d3, "dark4": d4, "dark5": d5}


def init_hrpafpn(key, depth=1.0, width=1.0, in_channels=(128, 256, 512, 1024)):
    n = round(3 * depth)
    c0, c1, c2, c3 = [int(c * width) for c in in_channels]
    keys = jax.random.split(key, 13)
    return {
        "backbone": init_darknet(keys[0], depth, width),
        "lateral_conv0": init_conv(keys[1], c3, c2, 1),
        "C3_p4": init_csp(keys[2], 2 * c2, c2, n, shortcut=False),
        "reduce_conv1": init_conv(keys[3], c2, c1, 1),
        "C3_p3": init_csp(keys[4], 2 * c1, c1, n, shortcut=False),
        "reduce_conv2": init_conv(keys[5], c1, c0, 1),
        "C3_p2": init_csp(keys[6], 2 * c0, c0, n, shortcut=False),
        "bu_conv3": init_conv(keys[7], c0, c0, 3),
        "C3_n2": init_csp(keys[8], 2 * c0, c1, n, shortcut=False),
        "bu_conv2": init_conv(keys[9], c1, c1, 3),
        "C3_n3": init_csp(keys[10], 2 * c1, c2, n, shortcut=False),
        "bu_conv1": init_conv(keys[11], c2, c2, 3),
        "C3_n4": init_csp(keys[12], 2 * c2, c3, n, shortcut=False),
    }


def hrpafpn_forward(x_nchw, p):
    # NCHW at the boundary (PyTorch convention); bf16 NHWC inside.
    x = jnp.transpose(x_nchw, (0, 2, 3, 1)).astype(jnp.bfloat16)
    feats = darknet_forward(x, p["backbone"])
    x3, x2, x1, x0 = feats["dark2"], feats["dark3"], feats["dark4"], feats["dark5"]

    fpn_out0 = base_conv(x0, p["lateral_conv0"], 1)
    f_out0 = csp_layer([upsample2_nearest(fpn_out0), x1], p["C3_p4"])       # fused concat

    fpn_out1 = base_conv(f_out0, p["reduce_conv1"], 1)
    f_out1 = csp_layer([upsample2_nearest(fpn_out1), x2], p["C3_p3"])       # fused concat

    fpn_out2 = base_conv(f_out1, p["reduce_conv2"], 1)
    pan_out3 = csp_layer([upsample2_nearest(fpn_out2), x3], p["C3_p2"])     # fused concat

    p_out2 = base_conv(pan_out3, p["bu_conv3"], 2)
    pan_out2 = csp_layer([p_out2, fpn_out2], p["C3_n2"])                    # fused concat

    p_out1 = base_conv(pan_out2, p["bu_conv2"], 2)
    pan_out1 = csp_layer([p_out1, fpn_out1], p["C3_n3"])                    # fused concat

    p_out0 = base_conv(pan_out1, p["bu_conv1"], 2)
    pan_out0 = csp_layer([p_out0, fpn_out0], p["C3_n4"])                    # fused concat

    outs = (pan_out3, pan_out2, pan_out1, pan_out0)
    return tuple(jnp.transpose(o, (0, 3, 1, 2)).astype(jnp.float32) for o in outs)  # back to NCHW


if __name__ == "__main__":
    # Small deterministic config: width=1/16 -> channels [8,16,32,64]; depth=0.33 -> 1 block/CSP.
    DEPTH, WIDTH = 0.33, 0.0625
    key = jax.random.PRNGKey(0)
    k_in, k_par = jax.random.split(key)

    # Input NCHW; spatial 64 so strides /4,/8,/16,/32 give 16,8,4,2 feature maps.
    x = jax.random.normal(k_in, (2, 3, 64, 64), jnp.float32)
    params = init_hrpafpn(k_par, depth=DEPTH, width=WIDTH)

    outs = hrpafpn_forward(x, params)
    outs = jax.block_until_ready(outs)

    expect = [(2, 8, 16, 16), (2, 16, 8, 8), (2, 32, 4, 4), (2, 64, 2, 2)]
    assert [tuple(o.shape) for o in outs] == expect, [tuple(o.shape) for o in outs]
    assert all(bool(jnp.all(jnp.isfinite(o))) for o in outs)
    print("KERNEL_OK")
</pallas_src>

<mosaic_0001>
module attributes {stable_mosaic.version = 11 : i64} {
  func.func @_conv3x3_s1_kernel(%arg0: i32, %arg1: memref<1x34x34x12xbf16, #tpu.memory_space<vmem>>, %arg2: memref<108x4xbf16, #tpu.memory_space<vmem>>, %arg3: memref<1x4xf32, #tpu.memory_space<vmem>>, %arg4: memref<1x4xf32, #tpu.memory_space<vmem>>, %arg5: memref<1x32x32x4xbf16, #tpu.memory_space<vmem>>) attributes {dimension_semantics = [#tpu.dimension_semantics<parallel>], iteration_bounds = array<i64: 2>, scalar_prefetch = 0 : i64, scratch_operands = 0 : i64, tpu.core_type = #tpu.core_type<tc>, window_params = [{transform_indices = @transform_0, window_bounds = array<i64: 1, 34, 34, 12>}, {pipeline_mode = #tpu.pipeline_mode<synchronous>, transform_indices = @transform_1, window_bounds = array<i64: 108, 4>}, {pipeline_mode = #tpu.pipeline_mode<synchronous>, transform_indices = @transform_2, window_bounds = array<i64: 1, 4>}, {pipeline_mode = #tpu.pipeline_mode<synchronous>, transform_indices = @transform_3, window_bounds = array<i64: 1, 4>}, {transform_indices = @transform_4, window_bounds = array<i64: 1, 32, 32, 4>}]} {
    %c0 = arith.constant 0 : index
    %c0_0 = arith.constant 0 : index
    %0 = vector.load %arg2[%c0, %c0_0] : memref<108x4xbf16, #tpu.memory_space<vmem>>, vector<108x4xbf16>
    %1 = vector.extract_strided_slice %0 {offsets = [0, 0], sizes = [12, 4], strides = [1, 1]} : vector<108x4xbf16> to vector<12x4xbf16>
    %2 = vector.extract_strided_slice %0 {offsets = [12, 0], sizes = [12, 4], strides = [1, 1]} : vector<108x4xbf16> to vector<12x4xbf16>
    %3 = vector.extract_strided_slice %0 {offsets = [24, 0], sizes = [12, 4], strides = [1, 1]} : vector<108x4xbf16> to vector<12x4xbf16>
    %4 = vector.extract_strided_slice %0 {offsets = [36, 0], sizes = [12, 4], strides = [1, 1]} : vector<108x4xbf16> to vector<12x4xbf16>
    %5 = vector.extract_strided_slice %0 {offsets = [48, 0], sizes = [12, 4], strides = [1, 1]} : vector<108x4xbf16> to vector<12x4xbf16>
    %6 = vector.extract_strided_slice %0 {offsets = [60, 0], sizes = [12, 4], strides = [1, 1]} : vector<108x4xbf16> to vector<12x4xbf16>
    %7 = vector.extract_strided_slice %0 {offsets = [72, 0], sizes = [12, 4], strides = [1, 1]} : vector<108x4xbf16> to vector<12x4xbf16>
    %8 = vector.extract_strided_slice %0 {offsets = [84, 0], sizes = [12, 4], strides = [1, 1]} : vector<108x4xbf16> to vector<12x4xbf16>
    %9 = vector.extract_strided_slice %0 {offsets = [96, 0], sizes = [12, 4], strides = [1, 1]} : vector<108x4xbf16> to vector<12x4xbf16>
    %c0_1 = arith.constant 0 : index
    %c0_2 = arith.constant 0 : index
    %10 = vector.load %arg3[%c0_1, %c0_2] : memref<1x4xf32, #tpu.memory_space<vmem>>, vector<1x4xf32>
    %c0_3 = arith.constant 0 : index
    %c0_4 = arith.constant 0 : index
    %11 = vector.load %arg4[%c0_3, %c0_4] : memref<1x4xf32, #tpu.memory_space<vmem>>, vector<1x4xf32>
    %c0_i32 = arith.constant 0 : i32
    %c32_i32 = arith.constant 32 : i32
    %12 = arith.addi %c0_i32, %c32_i32 : i32
    %c1_i32 = arith.constant 1 : i32
    scf.for %arg6 = %c0_i32 to %12 step %c1_i32  : i32 {
      %c1_i32_6 = arith.constant 1 : i32
      %13 = arith.muli %arg6, %c1_i32_6 : i32
      %c0_i32_7 = arith.constant 0 : i32
      %14 = arith.addi %c0_i32_7, %13 : i32
      %cst = arith.constant 0.000000e+00 : f32
      %15 = vector.broadcast %cst : f32 to vector<32x4xf32>
      %c0_i32_8 = arith.constant 0 : i32
      %16 = arith.addi %14, %c0_i32_8 : i32
      %c0_9 = arith.constant 0 : index
      %17 = arith.index_cast %16 : i32 to index
      %c0_10 = arith.constant 0 : index
      %c0_11 = arith.constant 0 : index
      %18 = vector.load %arg1[%c0_9, %17, %c0_10, %c0_11] : memref<1x34x34x12xbf16, #tpu.memory_space<vmem>>, vector<1x1x34x12xbf16>
      %19 = vector.shape_cast %18 : vector<1x1x34x12xbf16> to vector<34x12xbf16>
      %20 = vector.extract_strided_slice %19 {offsets = [0, 0], sizes = [32, 12], strides = [1, 1]} : vector<34x12xbf16> to vector<32x12xbf16>
      %cst_12 = arith.constant dense<0.000000e+00> : vector<32x4xf32>
      %21 = tpu.matmul %20, %1, %cst_12 {dimension_numbers = #tpu.dot_dimension_numbers<[1], [0], [0], [1], [0, 0, 1, 1], [], []>} : vector<32x12xbf16>, vector<12x4xbf16>, vector<32x4xf32> -> vector<32x4xf32>
      %22 = arith.addf %15, %21 : vector<32x4xf32>
      %23 = vector.extract_strided_slice %19 {offsets = [1, 0], sizes = [32, 12], strides = [1, 1]} : vector<34x12xbf16> to vector<32x12xbf16>
      %cst_13 = arith.constant dense<0.000000e+00> : vector<32x4xf32>
      %24 = tpu.matmul %23, %2, %cst_13 {dimension_numbers = #tpu.dot_dimension_numbers<[1], [0], [0], [1], [0, 0, 1, 1], [], []>} : vector<32x12xbf16>, vector<12x4xbf16>, vector<32x4xf32> -> vector<32x4xf32>
      %25 = arith.addf %22, %24 : vector<32x4xf32>
      %26 = vector.extract_strided_slice %19 {offsets = [2, 0], sizes = [32, 12], strides = [1, 1]} : vector<34x12xbf16> to vector<32x12xbf16>
      %cst_14 = arith.constant dense<0.000000e+00> : vector<32x4xf32>
      %27 = tpu.matmul %26, %3, %cst_14 {dimension_numbers = #tpu.dot_dimension_numbers<[1], [0], [0], [1], [0, 0, 1, 1], [], []>} : vector<32x12xbf16>, vector<12x4xbf16>, vector<32x4xf32> -> vector<32x4xf32>
      %28 = arith.addf %25, %27 : vector<32x4xf32>
      %c1_i32_15 = arith.constant 1 : i32
      %29 = arith.addi %14, %c1_i32_15 : i32
      %c0_16 = arith.constant 0 : index
      %30 = arith.index_cast %29 : i32 to index
      %c0_17 = arith.constant 0 : index
      %c0_18 = arith.constant 0 : index
      %31 = vector.load %arg1[%c0_16, %30, %c0_17, %c0_18] : memref<1x34x34x12xbf16, #tpu.memory_space<vmem>>, vector<1x1x34x12xbf16>
      %32 = vector.shape_cast %31 : vector<1x1x34x12xbf16> to vector<34x12xbf16>
      %33 = vector.extract_strided_slice %32 {offsets = [0, 0], sizes = [32, 12], strides = [1, 1]} : vector<34x12xbf16> to vector<32x12xbf16>
      %cst_19 = arith.constant dense<0.000000e+00> : vector<32x4xf32>
      %34 = tpu.matmul %33, %4, %cst_19 {dimension_numbers = #tpu.dot_dimension_numbers<[1], [0], [0], [1], [0, 0, 1, 1], [], []>} : vector<32x12xbf16>, vector<12x4xbf16>, vector<32x4xf32> -> vector<32x4xf32>
      %35 = arith.addf %28, %34 : vector<32x4xf32>
      %36 = vector.extract_strided_slice %32 {offsets = [1, 0], sizes = [32, 12], strides = [1, 1]} : vector<34x12xbf16> to vector<32x12xbf16>
      %cst_20 = arith.constant dense<0.000000e+00> : vector<32x4xf32>
      %37 = tpu.matmul %36, %5, %cst_20 {dimension_numbers = #tpu.dot_dimension_numbers<[1], [0], [0], [1], [0, 0, 1, 1], [], []>} : vector<32x12xbf16>, vector<12x4xbf16>, vector<32x4xf32> -> vector<32x4xf32>
      %38 = arith.addf %35, %37 : vector<32x4xf32>
      %39 = vector.extract_strided_slice %32 {offsets = [2, 0], sizes = [32, 12], strides = [1, 1]} : vector<34x12xbf16> to vector<32x12xbf16>
      %cst_21 = arith.constant dense<0.000000e+00> : vector<32x4xf32>
      %40 = tpu.matmul %39, %6, %cst_21 {dimension_numbers = #tpu.dot_dimension_numbers<[1], [0], [0], [1], [0, 0, 1, 1], [], []>} : vector<32x12xbf16>, vector<12x4xbf16>, vector<32x4xf32> -> vector<32x4xf32>
      %41 = arith.addf %38, %40 : vector<32x4xf32>
      %c2_i32 = arith.constant 2 : i32
      %42 = arith.addi %14, %c2_i32 : i32
      %c0_22 = arith.constant 0 : index
      %43 = arith.index_cast %42 : i32 to index
      %c0_23 = arith.constant 0 : index
      %c0_24 = arith.constant 0 : index
      %44 = vector.load %arg1[%c0_22, %43, %c0_23, %c0_24] : memref<1x34x34x12xbf16, #tpu.memory_space<vmem>>, vector<1x1x34x12xbf16>
      %45 = vector.shape_cast %44 : vector<1x1x34x12xbf16> to vector<34x12xbf16>
      %46 = vector.extract_strided_slice %45 {offsets = [0, 0], sizes = [32, 12], strides = [1, 1]} : vector<34x12xbf16> to vector<32x12xbf16>
      %cst_25 = arith.constant dense<0.000000e+00> : vector<32x4xf32>
      %47 = tpu.matmul %46, %7, %cst_25 {dimension_numbers = #tpu.dot_dimension_numbers<[1], [0], [0], [1], [0, 0, 1, 1], [], []>} : vector<32x12xbf16>, vector<12x4xbf16>, vector<32x4xf32> -> vector<32x4xf32>
      %48 = arith.addf %41, %47 : vector<32x4xf32>
      %49 = vector.extract_strided_slice %45 {offsets = [1, 0], sizes = [32, 12], strides = [1, 1]} : vector<34x12xbf16> to vector<32x12xbf16>
      %cst_26 = arith.constant dense<0.000000e+00> : vector<32x4xf32>
      %50 = tpu.matmul %49, %8, %cst_26 {dimension_numbers = #tpu.dot_dimension_numbers<[1], [0], [0], [1], [0, 0, 1, 1], [], []>} : vector<32x12xbf16>, vector<12x4xbf16>, vector<32x4xf32> -> vector<32x4xf32>
      %51 = arith.addf %48, %50 : vector<32x4xf32>
      %52 = vector.extract_strided_slice %45 {offsets = [2, 0], sizes = [32, 12], strides = [1, 1]} : vector<34x12xbf16> to vector<32x12xbf16>
      %cst_27 = arith.constant dense<0.000000e+00> : vector<32x4xf32>
      %53 = tpu.matmul %52, %9, %cst_27 {dimension_numbers = #tpu.dot_dimension_numbers<[1], [0], [0], [1], [0, 0, 1, 1], [], []>} : vector<32x12xbf16>, vector<12x4xbf16>, vector<32x4xf32> -> vector<32x4xf32>
      %54 = arith.addf %51, %53 : vector<32x4xf32>
      %55 = vector.broadcast %10 : vector<1x4xf32> to vector<32x4xf32>
      %56 = arith.mulf %54, %55 : vector<32x4xf32>
      %57 = vector.broadcast %11 : vector<1x4xf32> to vector<32x4xf32>
      %58 = arith.addf %56, %57 : vector<32x4xf32>
      %cst_28 = arith.constant 0.000000e+00 : f32
      %59 = vector.broadcast %cst_28 : f32 to vector<32x4xf32>
      %60 = arith.subf %59, %58 : vector<32x4xf32>
      %61 = math.exp %60 : vector<32x4xf32>
      %cst_29 = arith.constant 1.000000e+00 : f32
      %62 = vector.broadcast %cst_29 : f32 to vector<32x4xf32>
      %63 = arith.addf %62, %61 : vector<32x4xf32>
      %64 = tpu.reciprocal %63 {approx = true} : vector<32x4xf32> -> vector<32x4xf32>
      %65 = arith.mulf %58, %64 : vector<32x4xf32>
      %66 = vector.shape_cast %65 : vector<32x4xf32> to vector<1x1x32x4xf32>
      %67 = arith.truncf %66 : vector<1x1x32x4xf32> to vector<1x1x32x4xbf16>
      %c0_30 = arith.constant 0 : index
      %68 = arith.index_cast %14 : i32 to index
      %c0_31 = arith.constant 0 : index
      %c0_32 = arith.constant 0 : index
      %69 = vector.load %arg5[%c0_30, %68, %c0_31, %c0_32] : memref<1x32x32x4xbf16, #tpu.memory_space<vmem>>, vector<1x1x32x4xbf16>
      tpu.vector_store %arg5[%c0_30, %68, %c0_31, %c0_32], %67 {strides = array<i32>} : memref<1x32x32x4xbf16, #tpu.memory_space<vmem>>, vector<1x1x32x4xbf16>,
    }
    %c32_i32_5 = arith.constant 32 : i32
    return
  }
  func.func @transform_0(%arg0: i32) -> (i32, i32, i32, i32) {
    %c0_i32 = arith.constant 0 : i32
    %c0_i32_0 = arith.constant 0 : i32
    %c0_i32_1 = arith.constant 0 : i32
    %c0_i32_2 = arith.constant 0 : i32
    return %arg0, %c0_i32, %c0_i32_0, %c0_i32_1 : i32, i32, i32, i32
  }
  func.func @transform_1(%arg0: i32) -> (i32, i32) {
    %c0_i32 = arith.constant 0 : i32
    %c0_i32_0 = arith.constant 0 : i32
    %c0_i32_1 = arith.constant 0 : i32
    return %c0_i32, %c0_i32_0 : i32, i32
  }
  func.func @transform_2(%arg0: i32) -> (i32, i32) {
    %c0_i32 = arith.constant 0 : i32
    %c0_i32_0 = arith.constant 0 : i32
    %c0_i32_1 = arith.constant 0 : i32
    return %c0_i32, %c0_i32_0 : i32, i32
  }
  func.func @transform_3(%arg0: i32) -> (i32, i32) {
    %c0_i32 = arith.constant 0 : i32
    %c0_i32_0 = arith.constant 0 : i32
    %c0_i32_1 = arith.constant 0 : i32
    return %c0_i32, %c0_i32_0 : i32, i32
  }
  func.func @transform_4(%arg0: i32) -> (i32, i32, i32, i32) {
    %c0_i32 = arith.constant 0 : i32
    %c0_i32_0 = arith.constant 0 : i32
    %c0_i32_1 = arith.constant 0 : i32
    %c0_i32_2 = arith.constant 0 : i32
    return %arg0, %c0_i32, %c0_i32_0, %c0_i32_1 : i32, i32, i32, i32
  }
}

</mosaic_0001>

<bundles_post_ra>
// kernel: tpu_custom_call.1
= control target key start
LH: loop header
LB: loop body
LE: loop exit
PB: predicated region body
PF: predicated region fallthrough
CT: control target
= control target key end

     0   :  { %s1365_s15 = smov 0   ;;  %s1585_s0 = inlined_call_operand.vmem [shape: bf16[2,34,34,12], index: 0, kind: input, shape index: {}]   ;;  %s1586_s1 = inlined_call_operand.vmem [shape: bf16[108,4], index: 1, kind: input, shape index: {}]   ;;  %s1587_s2 = inlined_call_operand.vmem [shape: f32[1,4], index: 2, kind: input, shape index: {}]   ;;  %s1588_s3 = inlined_call_operand.vmem [shape: f32[1,4], index: 3, kind: input, shape index: {}]   ;;  %s1589_s4 = inlined_call_operand.vmem [shape: bf16[2,32,32,4], index: 4, kind: output, shape index: {}]  }
   0x1 LB: > { %s1088_s16 = sadd.s32 4294967295, %s1334_s15   ;;  %p1092_p0 = scmp.ge.s32.totalorder %s1334_s15, 1  ;;  %s1334_s15 = sphi %s1365_s15, %s14_s15  }
   0x2   : > { %p162_p1 = scmp.lt.s32.totalorder %s1334_s15, 3 }
   0x4   : > { %p163_p2 = pnand %p1092_p0, %p162_p1 }
   0x5   : > { %p188_p3 = scmp.lt.s32.totalorder (!%p163_p2), %s1088_s16, 1  ;;  %v1376_v0 = vld [vmem:[%s1586_s1] sm:$0xf] (!%p163_p2)  ;;  %v1381_v1 = vld [vmem:[%s1586_s1 + $0x4] sm:$0xf] (!%p163_p2)  ;;  %s1463_s6 = smov (!%p163_p2), 0  }
   0x6   : > { %166 = sbr.rel (%p163_p2) target bundleno = 333 (0x14d), region = 36  ;;  %v1386_v2 = vld [vmem:[%s1586_s1 + $0x8] sm:$0xf] (!%p163_p2)  ;;  %v1391_v3 = vld [vmem:[%s1586_s1 + $0xc] sm:$0xf] (!%p163_p2) }
   0x7   : > { %v1396_v4 = vld [vmem:[%s1586_s1 + $0x10] sm:$0xf] (!%p163_p2)  ;;  %v1401_v5 = vld [vmem:[%s1586_s1 + $0x14] sm:$0xf] (!%p163_p2)  ;;  %v1406_v6 = vld [vmem:[%s1586_s1 + $0x18] sm:$0xf] (!%p163_p2) }
   0x8   : > { %v1411_v7 = vld [vmem:[%s1586_s1 + $0x1c] sm:$0xf] (!%p163_p2)  ;;  %v1416_v8 = vld [vmem:[%s1586_s1 + $0x20] sm:$0xf] (!%p163_p2)  ;;  %v1421_v9 = vld [vmem:[%s1586_s1 + $0x24] sm:$0xf] (!%p163_p2) }
   0x9   : > { %v1426_v10 = vld [vmem:[%s1586_s1 + $0x28] sm:$0xf] (!%p163_p2)  ;;  %v1431_v11 = vld [vmem:[%s1586_s1 + $0x2c] sm:$0xf] (!%p163_p2)  ;;  %v1441_v12 = vld [vmem:[%s1586_s1 + $0x30] sm:$0xf] (!%p163_p2) }
   0xa   : > { %v1446_v13 = vld [vmem:[%s1586_s1 + $0x34] sm:$0x3] (!%p163_p2)  ;;  %v1451_v14 = vld [vmem:[%s1587_s2] ss:$0 sm:$0xff] (!%p163_p2) }
   0xb   : > { %v1461_v15 = vld [vmem:[%s1588_s3] ss:$0 sm:$0xff] (!%p163_p2) }
   0xd   : > { %s1591_s16 = smov (!%p188_p3, %s1088_s16), 1 }
   0xe   : > { %s1282_s11 = smul.u32 680, %s1591_s16  ;;  %s1153_s12 = sshll.u32 %s1591_s16, 9 }
   0xf   : > { %s1436_s21 = scalar_lea.vmem %s1589_s4, %s1153_s12 }
  0x10   : > { %s1456_s29 = scalar_lea.vmem %s1585_s0, %s1282_s11 }
  0x11 LB: >> { %vm276_vm0 = vcmask 1045504   ;;  %v1120_v16 = vcombine.low %v1406_v6, %v1411_v7  ;;  %v1100_v17 = vcombine.low %v1381_v1, %v1386_v2  ;;  %v1123_v18 = vcombine.low %v1411_v7, %v1416_v8  ;;  %s1154_s7 = smul.u32 20, %s1338_s6  ;;  %s1159_s9 = sshll.u32 %s1338_s6, 4  ;;  %s1338_s6 = sphi %s1463_s6, %s220_s6  }
  0x12   : >> { %v1103_v21 = vcombine.low %v1376_v0, %v1381_v1  ;;  %vm242_vm1 = vsmask.f32 7424  ;;  %vm269_vm2 = vcmask 97280   ;;  %vm388_vm3 = vcmask 1046528   ;;  %s1012_s10 = scalar_lea.vmem %s1436_s21, %s1159_s9  ;;  %s220_s6 = sadd.s32 1, %s1338_s6  }
  0x13   : >> { %1277 = vmatprep.subr.msk.bf16.mxu0 %vm276_vm0, %v1120_v16  ;;  %v268_v19 = vrot.slane %v1100_v17, 2  ;;  %v579_v20 = vsel %vm276_vm0, %v1120_v16, 0  ;;  %v642_v22 = vrot.slane %v1123_v18, 2  ;;  %s1482_s8 = scalar_lea.vmem %s1456_s29, %s1154_s7  ;;  %v1133_v55 = vcombine.low %v1421_v9, %v1426_v10  ;;  %p217_p4 = scmp.ge.s32.totalorder %s220_s6, 32  }
  0x14   : >> { %1212 = vmatpush3.bf16.msra.mxu0 %v579_v20  ;;  %v1299_v24 = vld [vmem:[%s1482_s8] sm:$0xff]   ;;  %v1487_v25 = vld [vmem:[%s1482_s8 + $0x8] sm:$0xff]   ;;  %v1493_v30 = vld [vmem:[%s1482_s8 + $0x14] sm:$0xff]   ;;  %v337_v52 = vsel %vm276_vm0, %v1103_v21, 0  ;;  %v1106_v59 = vcombine.low %v1391_v3, %v1396_v4  ;;  %v1116_v63 = vcombine.low %v1396_v4, %v1401_v5  ;;  %v1137_v17 = vcombine.low %v1426_v10, %v1431_v11 }
  0x15   : >> { %1273 = vmatprep.subr.msk.bf16.mxu1 %vm276_vm0, %v268_v19  ;;  %v278_v23 = vsel %vm276_vm0, %v268_v19, 0  ;;  %1278 = vmatprep.subr.msk.bf16.mxu0 %vm276_vm0, %v642_v22  ;;  %v244_v26 = vshrl.u32 %v1299_v24, 16  ;;  %v246_v27 = vshll.u32 %v1299_v24, 16  ;;  %v251_v28 = vshll.u32 %v1487_v25, 16  ;;  %v1496_v31 = vld [vmem:[%s1482_s8 + $0x1c] sm:$0xff]   ;;  %v1305_v20 = vld [vmem:[%s1482_s8 + $0x28] sm:$0xff]  }
  0x16   : >> { %1188 = vmatpush3.bf16.msra.mxu1 %v278_v23  ;;  %v255_v29 = vshrl.u32 %v1487_v25, 16  ;;  %v1499_v34 = vld [vmem:[%s1482_s8 + $0x10] ss:$0 sps:$4 sm:$0x11]   ;;  %v549_v35 = vshrl.u32 %v1493_v30, 16  ;;  %v551_v36 = vshll.u32 %v1493_v30, 16 }
  0x17   : >> { %1274 = vmatprep.subr.msk.bf16.mxu1 %vm276_vm0, %v1103_v21  ;;  %v248_v32 = vrot.slane %v246_v27, 1  ;;  %v253_v33 = vrot.slane %v251_v28, 1  ;;  %v555_v37 = vshll.u32 %v1496_v31, 16  ;;  %v559_v38 = vshrl.u32 %v1496_v31, 16  ;;  %v1306_v27 = vld [vmem:[%s1482_s8 + $0x30] sm:$0xff]  }
  0x18   : >> { %v259_v41 = vshll.u32 %v1499_v34, 16  ;;  %v1304_v42 = vld [vmem:[%s1482_s8 + $0x24] ss:$0 sps:$4 sm:$0x11]   ;;  %v553_v43 = vrot.slane %v551_v36, 1  ;;  %v634_v45 = vrot.slane %v1493_v30, 1 }
  0x19   : >> { %v249_v39 = vor.u32 %v248_v32, %v244_v26  ;;  %v257_v40 = vor.u32 %v255_v29, %v253_v33  ;;  %v557_v44 = vrot.slane %v555_v37, 1  ;;  %v635_v46 = vrot.slane %v1496_v31, 1 }
  0x1a   : >> { %v261_v48 = vrot.slane %v259_v41, 1  ;;  %v563_v49 = vshll.u32 %v1304_v42, 16  ;;  %v554_v50 = vor.u32 %v553_v43, %v549_v35  ;;  %v650_v57 = vsel %vm276_vm0, %v642_v22, 0 }
  0x1b   : >> { %v254_v47 = vsel %vm242_vm1, %v249_v39, %v253_v33  ;;  %v561_v51 = vor.u32 %v559_v38, %v557_v44  ;;  %v636_v58 = vsel %vm388_vm3, %v634_v45, %v635_v46  ;;  %v389_v61 = vrot.slane %v1299_v24, 1  ;;  %v1307_v38 = vld [vmem:[%s1482_s8 + $0x38] ss:$0 sps:$4 sm:$0x11]  }
  0x1c   : >> { %1189 = vmatprep.mubr.msk.bf16.mxu1 %vm269_vm2, %v254_v47  ;;  %v262_v53 = vsel %vm242_vm1, %v257_v40, %v261_v48  ;;  %v565_v54 = vrot.slane %v563_v49, 1  ;;  %v558_v56 = vsel %vm242_vm1, %v554_v50, %v557_v44  ;;  %v390_v62 = vrot.slane %v1487_v25, 1 }
  0x1d   : >> { %1190 = vmatmul.mubr.msk.bf16.vlgmr.msra.gmra.mrb[0].mxu1 %vm269_vm2, %v262_v53  ;;  %1213 = vmatprep.mubr.msk.bf16.mxu0 %vm269_vm2, %v558_v56  ;;  %v637_v16 = vrot.slane %v1304_v42, 1  ;;  %v406_v18 = vsel %vm276_vm0, %v1106_v59, 0  ;;  %v483_v21 = vrot.slane %v1116_v63, 2  ;;  %v736_v23 = vsel %vm276_vm0, %v1133_v55, 0 }
  0x1e   : >> { %v566_v60 = vsel %vm242_vm1, %v561_v51, %v565_v54  ;;  %1194 = vmatpush3.bf16.msra.mxu1 %v337_v52  ;;  %1195 = vmatprep.mubr.msk.bf16.mxu1 %vm269_vm2, %v1299_v24  ;;  %v391_v19 = vsel %vm388_vm3, %v389_v61, %v390_v62  ;;  %v815_v24 = vrot.slane %v1137_v17, 2  ;;  %v796_v26 = vshll.u32 %v1305_v20, 16 }
  0x1f   : >> { %1214 = vmatmul.mubr.msk.bf16.vlgmr.msra.gmra.mrb[0].mxu0 %vm269_vm2, %v566_v60  ;;  %1275 = vmatprep.subr.msk.bf16.mxu1 %vm276_vm0, %v1106_v59  ;;  %v638_v22 = vsel %vm388_vm3, %v635_v46, %v637_v16  ;;  %v794_v28 = vshrl.u32 %v1305_v20, 16  ;;  %v800_v29 = vshll.u32 %v1306_v27, 16  ;;  %v392_v32 = vrot.slane %v1499_v34, 1 }
  0x20   : >> { %1218 = vmatpush3.bf16.msra.mxu0 %v650_v57  ;;  %1219 = vmatprep.mubr.msk.bf16.mxu0 %vm269_vm2, %v636_v58  ;;  %v491_v37 = vsel %vm276_vm0, %v483_v21, 0  ;;  %v823_v39 = vsel %vm276_vm0, %v815_v24, 0  ;;  %v1140_v41 = vcombine.low %v1441_v12, %v1446_v13  ;;  %v804_v34 = vshrl.u32 %v1306_v27, 16 }
  0x21   : >> { %1279 = vmatprep.subr.msk.bf16.mxu0 %vm276_vm0, %v1133_v55  ;;  %v802_v35 = vrot.slane %v800_v29, 1  ;;  %v393_v36 = vsel %vm388_vm3, %v390_v62, %v392_v32  ;;  %v808_v42 = vshll.u32 %v1307_v38, 16  ;;  %v878_v45 = vrot.slane %v1305_v20, 1 }
  0x22   : >> { %v879_v46 = vrot.slane %v1306_v27, 1  ;;  %v881_v49 = vrot.slane %v1307_v38, 1  ;;  %vm1013_vm4 = vcmask 27648  }
  0x23   : >> { %v806_v43 = vor.u32 %v804_v34, %v802_v35  ;;  %v810_v44 = vrot.slane %v808_v42, 1 }
  0x24   : >> { %v880_v48 = vsel %vm388_vm3, %v878_v45, %v879_v46  ;;  %v882_v50 = vsel %vm388_vm3, %v879_v46, %v881_v49 }
  0x25   : >> { %v811_v47 = vsel %vm242_vm1, %v806_v43, %v810_v44 }
  0x29   : >> { %1196 = vmatmul.mubr.msk.bf16.vlgmr.msra.gmra.mrb[0].mxu1 %vm269_vm2, %v1487_v25  ;;  %v798_v25 = vrot.slane %v796_v26, 1 }
  0x2a   : >> { %1200 = vmatpush3.bf16.msra.mxu1 %v406_v18  ;;  %1201 = vmatprep.mubr.msk.bf16.mxu1 %vm269_vm2, %v391_v19 }
  0x2b   : >> { %1220 = vmatmul.mubr.msk.bf16.vlgmr.msra.gmra.mrb[0].mxu0 %vm269_vm2, %v638_v22  ;;  %1276 = vmatprep.subr.msk.bf16.mxu1 %vm276_vm0, %v483_v21  ;;  %v799_v33 = vor.u32 %v798_v25, %v794_v28 }
  0x2c   : >> { %1224 = vmatpush3.bf16.msra.mxu0 %v736_v23  ;;  %1225 = vmatprep.mubr.msk.bf16.mxu0 %vm269_vm2, %v1305_v20 }
  0x2d   : >> { %1280 = vmatprep.subr.msk.bf16.mxu0 %vm276_vm0, %v815_v24  ;;  %v803_v40 = vsel %vm242_vm1, %v799_v33, %v802_v35 }
  0x35   : >> { %1202 = vmatmul.mubr.msk.bf16.vlgmr.msra.gmra.mrb[0].mxu1 %vm269_vm2, %v393_v36 }
  0x36   : >> { %1206 = vmatpush3.bf16.msra.mxu1 %v491_v37  ;;  %1207 = vmatprep.mubr.msk.bf16.mxu1 %vm269_vm2, %v1493_v30  ;;  %v895_v30 = vsel %vm276_vm0, %v1140_v41, 0 }
  0x37   : >> { %1226 = vmatmul.mubr.msk.bf16.vlgmr.msra.gmra.mrb[0].mxu0 %vm269_vm2, %v1306_v27 }
  0x38   : >> { %1230 = vmatpush3.bf16.msra.mxu0 %v823_v39  ;;  %1231 = vmatprep.mubr.msk.bf16.mxu0 %vm269_vm2, %v803_v40 }
  0x39   : >> { %1281 = vmatprep.subr.msk.bf16.mxu0 %vm276_vm0, %v1140_v41 }
  0x41   : >> { %1208 = vmatmul.mubr.msk.bf16.vlgmr.msra.gmra.mrb[0].mxu1 %vm269_vm2, %v1496_v31 }
  0x43   : >> { %1232 = vmatmul.mubr.msk.bf16.vlgmr.msra.gmra.mrb[0].mxu0 %vm269_vm2, %v811_v47 }
  0x44   : >> { %1236 = vmatpush3.bf16.msra.mxu0 %v895_v30  ;;  %1237 = vmatprep.mubr.msk.bf16.mxu0 %vm269_vm2, %v880_v48 }
  0x4f   : >> { %1238 = vmatmul.mubr.msk.bf16.vlgmr.msra.gmra.mrb[0].mxu0 %vm269_vm2, %v882_v50 }
 0x114   : >> { %v1209_v51 = vpop.f32.mrb[0].mxu1 }
 0x115   : >> { %v527_v52 = vpop.f32.mrb[1].mxu1 }
 0x116   : >> { %v1210_v53 = vpop.f32.mrb[2].mxu1 }
 0x117   : >> { %v530_v54 = vpop.f32.mrb[3].mxu1 }
 0x122   : >> { %v1239_v55 = vpop.f32.mrb[0].mxu0 }
 0x123   : >> { %v1241_v31 = vadd.f32 %v1239_v55, %v1209_v51  ;;  %v931_v56 = vpop.f32.mrb[1].mxu0 }
 0x124   : >> { %v1242_v57 = vadd.f32 %v931_v56, %v527_v52  ;;  %v1240_v58 = vpop.f32.mrb[2].mxu0 }
 0x125   : >> { %v958_v59 = vmul.f32 %v1241_v31, %v1451_v14  ;;  %v1243_v60 = vadd.f32 %v1240_v58, %v1210_v53  ;;  %v934_v61 = vpop.f32.mrb[3].mxu0 }
 0x126   : >> { %v956_v62 = vmul.f32 %v1242_v57, %v1451_v14  ;;  %v1244_v63 = vadd.f32 %v934_v61, %v530_v54 }
 0x127   : >> { %v968_v16 = vadd.f32 %v1461_v15, %v958_v59  ;;  %v959_v17 = vmul.f32 %v1243_v60, %v1451_v14 }
 0x128   : >> { %v966_v18 = vadd.f32 %v1461_v15, %v956_v62  ;;  %v957_v19 = vmul.f32 %v1244_v63, %v1451_v14 }
 0x129   : >> { %v972_v20 = vsub.f32 0.0, %v968_v16  ;;  %v969_v21 = vadd.f32 %v1461_v15, %v959_v17 }
 0x12a   : >> { %v970_v22 = vsub.f32 0.0, %v966_v18  ;;  %v967_v23 = vadd.f32 %v1461_v15, %v957_v19 }
 0x12b   : >> { %v978_v24 = vmul.f32 1.442695, %v972_v20  ;;  %v973_v26 = vsub.f32 0.0, %v969_v21 }
 0x12c   : >> { %v974_v27 = vmul.f32 1.442695, %v970_v22  ;;  %v971_v28 = vsub.f32 0.0, %v967_v23 }
 0x12d   : >> { %1308 = vpow2.f32 %v978_v24  ;;  %v980_v25 = vmul.f32 1.442695, %v973_v26 }
 0x12e   : >> { %1310 = vpow2.f32 %v974_v27  ;;  %v976_v29 = vmul.f32 1.442695, %v971_v28 }
 0x12f   : >> { %1312 = vpow2.f32 %v980_v25 }
 0x130   : >> { %1314 = vpow2.f32 %v976_v29 }
 0x137   : >> { %v1309_v32 = vpop.eup %1308 }
 0x138   : >> { %v1311_v33 = vpop.eup %1310  ;;  %v984_v35 = vadd.f32 1.0, %v1309_v32 }
 0x139   : >> { %v1313_v36 = vpop.eup %1312  ;;  %v982_v37 = vadd.f32 1.0, %v1311_v33 }
 0x13a   : >> { %v1315_v38 = vpop.eup %1314  ;;  %1316 = vrcp.f32 %v984_v35  ;;  %v985_v39 = vadd.f32 1.0, %v1313_v36 }
 0x13b   : >> { %1318 = vrcp.f32 %v982_v37  ;;  %v983_v40 = vadd.f32 1.0, %v1315_v38 }
 0x13c   : >> { %1320 = vrcp.f32 %v985_v39 }
 0x13d   : >> { %1322 = vrcp.f32 %v983_v40 }
 0x144   : >> { %v1317_v41 = vpop.eup %1316 }
 0x145   : >> { %v1319_v34 = vpop.eup %1318  ;;  %v992_v42 = vmul.f32 %v1317_v41, %v968_v16 }
 0x146   : >> { %v1321_v43 = vpop.eup %1320  ;;  %v990_v44 = vmul.f32 %v1319_v34, %v966_v18  ;;  %219 = sbr.rel (!%p217_p4) target bundleno = 17 (0x11), region = 77 }
 0x147   : >> { %v1323_v45 = vpop.eup %1322  ;;  %v1157_v46 = vpack.c.bf16 %v992_v42, %v992_v42  ;;  %v993_v47 = vmul.f32 %v1321_v43, %v969_v21 }
 0x148   : >> { %v1155_v30 = vpack.c.bf16 %v990_v44, %v990_v44  ;;  %v991_v48 = vmul.f32 %v1323_v45, %v967_v23 }
 0x149   : >> { %1016 = vst.msk [vmem:[%s1012_s10 + $0x8] sm:$0xf] %vm1013_vm4, %v1157_v46  ;;  %v1158_v49 = vpack.c.bf16 %v993_v47, %v993_v47 }
 0x14a   : >> { %1014 = vst.msk [vmem:[%s1012_s10] sm:$0xf] %vm1013_vm4, %v1155_v30  ;;  %v1156_v50 = vpack.c.bf16 %v991_v48, %v991_v48 }
 0x14b   : >> { %1017 = vst.msk [vmem:[%s1012_s10 + $0xc] sm:$0xf] %vm1013_vm4, %v1158_v49 }
 0x14c   : >> { %1015 = vst.msk [vmem:[%s1012_s10 + $0x4] sm:$0xf] %vm1013_vm4, %v1156_v50 }
 0x14d PF: > { %s14_s15 = sadd.s32 1, %s1334_s15  }
 0x14e   : > { %p11_p5 = scmp.ge.s32.totalorder %s14_s15, 4  }
 0x150   :  { %13 = sbr.rel (!%p11_p5) target bundleno = 1 (0x1), region = 88 }

</bundles_post_ra>
